<compile_context>
chip_gen: v7x
topology: tpu7x:2x2x1
jax: 0.10.0
libtpu: 0.0.40
codegen_flags: <defaults>
</compile_context>

<pallas_src>
import jax
import jax.numpy as jnp
from jax.experimental import pallas as pl
from jax.experimental.pallas import tpu as pltpu

IN_FEATURES = 768
NUM_CLASSES = 2


def _round_up(x, m):
    return ((x + m - 1) // m) * m


def _tile_config():
    """Per-generation (tb_max, vmem_limit_bytes, min_grid_steps)."""
    try:
        kind = jax.devices()[0].device_kind.lower()
    except Exception:
        kind = ""
    if "v7" in kind or "tpu7" in kind:
        # 2 TCs/chip: want >=2 grid steps; tb=4096 -> 12 MiB x tile, 24 MiB
        # double-buffered, inside the 32 MiB default scoped / 64 MiB physical.
        return 4096, None, 2
    if "v6" in kind:
        # 128 MiB physical; raise scoped limit so the 24 MiB double-buffered x
        # tile plus weight/bias/output buffers fit comfortably.
        return 4096, 64 << 20, 1
    if "v5" in kind:
        # 16 MiB default scoped VMEM: tb=2048 -> 12 MiB double-buffered x.
        return 2048, None, 1
    return 2048, None, 1  # unknown generation: conservative, safe everywhere


def lr_kernel(x_ref, wt_ref, b_ref, o_ref):
    # x_ref: (TB, D)  wt_ref: (D, C)  b_ref: (1, C)  o_ref: (TB, C)
    logits = jnp.dot(
        x_ref[...], wt_ref[...], preferred_element_type=jnp.float32
    ) + b_ref[...]
    # Exact sigmoid: exp on the EUP, one exact divide on a tiny (TB, 2) tile
    # (free — the kernel is HBM-read-bound on x), matching torch.sigmoid.
    o_ref[...] = (1.0 / (1.0 + jnp.exp(-logits))).astype(o_ref.dtype)


def lr_forward(x, w, b, *, tb=None):
    """sigmoid(x @ w.T + b).  x: (B, 768), w: (2, 768) torch layout, b: (2,)."""
    B, D = x.shape
    C = w.shape[0]

    tb_max, vmem_limit, min_steps = _tile_config()
    sub = 16 if x.dtype == jnp.bfloat16 else 8  # bf16 packs 2 rows per sublane

    if tb is None:
        # Aim for >= min_steps grid steps (keeps both v7x TCs / HBM paths busy
        # on mid-sized batches), capped at the generation's VMEM-safe tile.
        tb = min(tb_max, _round_up(pl.cdiv(B, min_steps), sub))
    tb = max(sub, min(_round_up(tb, sub), tb_max))

    # No padding: partial last block is handled by Pallas (OOB input rows only
    # feed output rows whose stores are masked -> never observed).
    grid = (pl.cdiv(B, tb),)

    wt = jnp.transpose(w).astype(x.dtype)  # one-time (768, C) relayout, ~6 KB
    b2d = b.reshape(1, C).astype(jnp.float32)

    cp_kwargs = dict(dimension_semantics=("parallel",))
    if vmem_limit is not None:
        cp_kwargs["vmem_limit_bytes"] = vmem_limit

    itemsize = jnp.dtype(x.dtype).itemsize
    cost = pl.CostEstimate(
        flops=2 * B * D * C,
        transcendentals=B * C,
        bytes_accessed=B * D * itemsize + B * C * 4 + C * D * itemsize + C * 4,
    )

    return pl.pallas_call(
        lr_kernel,
        out_shape=jax.ShapeDtypeStruct((B, C), jnp.float32),
        grid_spec=pl.GridSpec(
            grid=grid,
            in_specs=[
                pl.BlockSpec((tb, D), lambda i: (i, 0)),  # x: streamed over batch
                pl.BlockSpec((D, C), lambda i: (0, 0)),   # w^T: VMEM-resident
                pl.BlockSpec((1, C), lambda i: (0, 0)),   # bias: VMEM-resident
            ],
            out_specs=pl.BlockSpec((tb, C), lambda i: (i, 0)),
        ),
        compiler_params=pltpu.CompilerParams(**cp_kwargs),
        cost_estimate=cost,
    )(x, wt, b2d)


if __name__ == "__main__":
    key = jax.random.PRNGKey(0)
    k_x, k_w, k_b = jax.random.split(key, 3)

    batch = 10  # non-multiple of the tile -> exercises the masked partial block

    # Mimic torch.nn.Linear default init: U(-1/sqrt(fan_in), 1/sqrt(fan_in)).
    bound = 1.0 / jnp.sqrt(jnp.float32(IN_FEATURES))
    w = jax.random.uniform(k_w, (NUM_CLASSES, IN_FEATURES),
                           minval=-bound, maxval=bound, dtype=jnp.float32)
    b = jax.random.uniform(k_b, (NUM_CLASSES,),
                           minval=-bound, maxval=bound, dtype=jnp.float32)
    x = jax.random.normal(k_x, (batch, IN_FEATURES), dtype=jnp.float32)

    ref = jax.nn.sigmoid(x @ w.T + b)

    # Small explicit tile (tb=8) -> grid of 2 steps with a masked partial block.
    out = jax.block_until_ready(lr_forward(x, w, b, tb=8))
    assert out.shape == (batch, NUM_CLASSES)
    assert jnp.allclose(out, ref, atol=2e-3, rtol=2e-3), float(
        jnp.max(jnp.abs(out - ref)))

    # Default (generation-aware) tile selection path.
    out2 = jax.block_until_ready(lr_forward(x, w, b))
    assert jnp.allclose(out2, ref, atol=2e-3, rtol=2e-3), float(
        jnp.max(jnp.abs(out2 - ref)))

    print("KERNEL_OK")
</pallas_src>

<mosaic_0001>
module attributes {stable_mosaic.version = 11 : i64} {
  func.func @lr_kernel(%arg0: i32, %arg1: memref<8x768xf32, #tpu.memory_space<vmem>>, %arg2: memref<768x2xf32, #tpu.memory_space<vmem>>, %arg3: memref<1x2xf32, #tpu.memory_space<vmem>>, %arg4: memref<8x2xf32, #tpu.memory_space<vmem>>) attributes {dimension_semantics = [#tpu.dimension_semantics<parallel>], iteration_bounds = array<i64: 2>, scalar_prefetch = 0 : i64, scratch_operands = 0 : i64, tpu.core_type = #tpu.core_type<tc>, window_params = [{transform_indices = @transform_0, window_bounds = array<i64: 8, 768>}, {pipeline_mode = #tpu.pipeline_mode<synchronous>, transform_indices = @transform_1, window_bounds = array<i64: 768, 2>}, {pipeline_mode = #tpu.pipeline_mode<synchronous>, transform_indices = @transform_2, window_bounds = array<i64: 1, 2>}, {transform_indices = @transform_3, window_bounds = array<i64: 8, 2>}]} {
    %c0 = arith.constant 0 : index
    %c0_0 = arith.constant 0 : index
    %0 = vector.load %arg1[%c0, %c0_0] : memref<8x768xf32, #tpu.memory_space<vmem>>, vector<8x768xf32>
    %c0_1 = arith.constant 0 : index
    %c0_2 = arith.constant 0 : index
    %1 = vector.load %arg2[%c0_1, %c0_2] : memref<768x2xf32, #tpu.memory_space<vmem>>, vector<768x2xf32>
    %cst = arith.constant dense<0.000000e+00> : vector<8x2xf32>
    %2 = tpu.matmul %0, %1, %cst {dimension_numbers = #tpu.dot_dimension_numbers<[1], [0], [0], [1], [0, 0, 1, 1], [], []>} : vector<8x768xf32>, vector<768x2xf32>, vector<8x2xf32> -> vector<8x2xf32>
    %c0_3 = arith.constant 0 : index
    %c0_4 = arith.constant 0 : index
    %3 = vector.load %arg3[%c0_3, %c0_4] : memref<1x2xf32, #tpu.memory_space<vmem>>, vector<1x2xf32>
    %4 = vector.broadcast %3 : vector<1x2xf32> to vector<8x2xf32>
    %5 = arith.addf %2, %4 : vector<8x2xf32>
    %cst_5 = arith.constant 0.000000e+00 : f32
    %6 = vector.broadcast %cst_5 : f32 to vector<8x2xf32>
    %7 = arith.subf %6, %5 : vector<8x2xf32>
    %8 = math.exp %7 : vector<8x2xf32>
    %cst_6 = arith.constant 1.000000e+00 : f32
    %9 = vector.broadcast %cst_6 : f32 to vector<8x2xf32>
    %10 = arith.addf %9, %8 : vector<8x2xf32>
    %cst_7 = arith.constant 1.000000e+00 : f32
    %11 = vector.broadcast %cst_7 : f32 to vector<8x2xf32>
    %12 = arith.divf %11, %10 : vector<8x2xf32>
    %c0_8 = arith.constant 0 : index
    %c0_9 = arith.constant 0 : index
    %13 = vector.load %arg4[%c0_8, %c0_9] : memref<8x2xf32, #tpu.memory_space<vmem>>, vector<8x2xf32>
    tpu.vector_store %arg4[%c0_8, %c0_9], %12 {strides = array<i32>} : memref<8x2xf32, #tpu.memory_space<vmem>>, vector<8x2xf32>,
    return
  }
  func.func @transform_0(%arg0: i32) -> (i32, i32) {
    %c0_i32 = arith.constant 0 : i32
    %c0_i32_0 = arith.constant 0 : i32
    return %arg0, %c0_i32 : i32, i32
  }
  func.func @transform_1(%arg0: i32) -> (i32, i32) {
    %c0_i32 = arith.constant 0 : i32
    %c0_i32_0 = arith.constant 0 : i32
    %c0_i32_1 = arith.constant 0 : i32
    return %c0_i32, %c0_i32_0 : i32, i32
  }
  func.func @transform_2(%arg0: i32) -> (i32, i32) {
    %c0_i32 = arith.constant 0 : i32
    %c0_i32_0 = arith.constant 0 : i32
    %c0_i32_1 = arith.constant 0 : i32
    return %c0_i32, %c0_i32_0 : i32, i32
  }
  func.func @transform_3(%arg0: i32) -> (i32, i32) {
    %c0_i32 = arith.constant 0 : i32
    %c0_i32_0 = arith.constant 0 : i32
    return %arg0, %c0_i32 : i32, i32
  }
}

</mosaic_0001>

<bundles_post_ra>
// kernel: tpu_custom_call.1
= control target key start
LH: loop header
LB: loop body
LE: loop exit
PB: predicated region body
PF: predicated region fallthrough
CT: control target
= control target key end

     0   :  { %s801_s12 = smov 0   ;;  %s1131_s0 = inlined_call_operand.vmem [shape: f32[10,768], index: 0, kind: input, shape index: {}]   ;;  %s1132_s1 = inlined_call_operand.vmem [shape: f32[768,2], index: 1, kind: input, shape index: {}]   ;;  %s1133_s2 = inlined_call_operand.vmem [shape: f32[1,2], index: 2, kind: input, shape index: {}]   ;;  %s1134_s3 = inlined_call_operand.vmem [shape: f32[10,2], index: 3, kind: output, shape index: {}]  }
   0x1 LB: > { %s549_s13 = sadd.s32 4294967295, %s779_s12   ;;  %p553_p0 = scmp.ge.s32.totalorder %s779_s12, 1  ;;  %s779_s12 = sphi %s801_s12, %s13_s12  }
   0x2   : > { %p137_p1 = scmp.lt.s32.totalorder %s779_s12, 3 }
   0x4   : > { %p138_p2 = pnand %p553_p0, %p137_p1 }
   0x5   : > { %v191_v0 = vld [vmem:[%s1132_s1 + $0x80] sm:$0xff] (!%p138_p2)  ;;  %v192_v1 = vld [vmem:[%s1132_s1 + $0x88] sm:$0xff] (!%p138_p2)  ;;  %v193_v11 = vld [vmem:[%s1132_s1 + $0x90] sm:$0xff] (!%p138_p2)  ;;  %p865_p3 = scmp.lt.s32.totalorder (!%p138_p2), %s549_s13, 1  ;;  %vm494_vm0 = vcmask (!%p138_p2), 15360  }
   0x6   : > { %141 = sbr.rel (%p138_p2) target bundleno = 318 (0x13e), region = 32  ;;  %v175_v2 = vld [vmem:[%s1132_s1] sm:$0xff] (!%p138_p2)  ;;  %v664_v3 = vpack.c.bf16 (!%p138_p2), %v192_v1, %v191_v0  ;;  %v176_v4 = vld [vmem:[%s1132_s1 + $0x8] sm:$0xff] (!%p138_p2)  ;;  %v194_v13 = vld [vmem:[%s1132_s1 + $0x98] sm:$0xff] (!%p138_p2) }
   0x7   : > { %v223_v5 = vld [vmem:[%s1132_s1 + $0x180] sm:$0xff] (!%p138_p2)  ;;  %v224_v6 = vld [vmem:[%s1132_s1 + $0x188] sm:$0xff] (!%p138_p2)  ;;  %v666_v7 = vpack.c.bf16 (!%p138_p2), %v176_v4, %v175_v2  ;;  %v177_v14 = vld [vmem:[%s1132_s1 + $0x10] sm:$0xff] (!%p138_p2)  ;;  %v668_v16 = vpack.c.bf16 (!%p138_p2), %v194_v13, %v193_v11 }
   0x8   : > { %v696_v8 = vpack.c.bf16 (!%p138_p2), %v224_v6, %v223_v5  ;;  %v207_v9 = vld [vmem:[%s1132_s1 + $0x100] sm:$0xff] (!%p138_p2)  ;;  %v208_v10 = vld [vmem:[%s1132_s1 + $0x108] sm:$0xff] (!%p138_p2)  ;;  %665 = vmatprep.subr.bf16.mxu0 (!%p138_p2), %v664_v3  ;;  %v178_v15 = vld [vmem:[%s1132_s1 + $0x18] sm:$0xff] (!%p138_p2) }
   0x9   : > { %v698_v12 = vpack.c.bf16 (!%p138_p2), %v208_v10, %v207_v9  ;;  %667 = vmatpush3.bf16.msra.mxu0 (!%p138_p2), %v666_v7  ;;  %v670_v17 = vpack.c.bf16 (!%p138_p2), %v178_v15, %v177_v14  ;;  %v225_v18 = vld [vmem:[%s1132_s1 + $0x190] sm:$0xff] (!%p138_p2)  ;;  %v226_v19 = vld [vmem:[%s1132_s1 + $0x198] sm:$0xff] (!%p138_p2)  ;;  %v195_v23 = vld [vmem:[%s1132_s1 + $0xa0] sm:$0xff] (!%p138_p2) }
   0xa   : > { %697 = vmatprep.subr.bf16.mxu1 (!%p138_p2), %v696_v8  ;;  %v209_v20 = vld [vmem:[%s1132_s1 + $0x110] sm:$0xff] (!%p138_p2)  ;;  %v700_v21 = vpack.c.bf16 (!%p138_p2), %v226_v19, %v225_v18  ;;  %v210_v22 = vld [vmem:[%s1132_s1 + $0x118] sm:$0xff] (!%p138_p2)  ;;  %v196_v24 = vld [vmem:[%s1132_s1 + $0xa8] sm:$0xff] (!%p138_p2)  ;;  %669 = vmatprep.subr.bf16.mxu0 (!%p138_p2), %v668_v16 }
   0xb   : > { %699 = vmatpush3.bf16.msra.mxu1 (!%p138_p2), %v698_v12  ;;  %v702_v25 = vpack.c.bf16 (!%p138_p2), %v210_v22, %v209_v20  ;;  %v672_v26 = vpack.c.bf16 (!%p138_p2), %v196_v24, %v195_v23  ;;  %v179_v27 = vld [vmem:[%s1132_s1 + $0x20] sm:$0xff] (!%p138_p2)  ;;  %v180_v28 = vld [vmem:[%s1132_s1 + $0x28] sm:$0xff] (!%p138_p2)  ;;  %v197_v35 = vld [vmem:[%s1132_s1 + $0xb0] sm:$0xff] (!%p138_p2) }
   0xc   : > { %v227_v29 = vld [vmem:[%s1132_s1 + $0x1a0] sm:$0xff] (!%p138_p2)  ;;  %701 = vmatprep.subr.bf16.mxu1 (!%p138_p2), %v700_v21  ;;  %v228_v30 = vld [vmem:[%s1132_s1 + $0x1a8] sm:$0xff] (!%p138_p2)  ;;  %v674_v33 = vpack.c.bf16 (!%p138_p2), %v180_v28, %v179_v27  ;;  %v198_v36 = vld [vmem:[%s1132_s1 + $0xb8] sm:$0xff] (!%p138_p2) }
   0xd   : > { %v211_v31 = vld [vmem:[%s1132_s1 + $0x120] sm:$0xff]  ;;  %v212_v32 = vld [vmem:[%s1132_s1 + $0x128] sm:$0xff]  ;;  %671 = vmatpush3.bf16.msra.mxu0 %v670_v17  ;;  %v704_v34 = vpack.c.bf16 %v228_v30, %v227_v29  ;;  %v181_v37 = vld [vmem:[%s1132_s1 + $0x30] sm:$0xff]  ;;  %v676_v39 = vpack.c.bf16 %v198_v36, %v197_v35  ;;  %s1137_s13 = smov (!%p865_p3, %s549_s13), 1 }
   0xe   : > { %673 = vmatprep.subr.bf16.mxu0 %v672_v26  ;;  %v706_v38 = vpack.c.bf16 %v212_v32, %v211_v31  ;;  %v182_v40 = vld [vmem:[%s1132_s1 + $0x38] sm:$0xff]  ;;  %v229_v41 = vld [vmem:[%s1132_s1 + $0x1b0] sm:$0xff]  ;;  %v199_v46 = vld [vmem:[%s1132_s1 + $0xc0] sm:$0xff]  ;;  %s760_s18 = smul.u32 48, %s1137_s13 }
   0xf   : > { %703 = vmatpush3.bf16.msra.mxu1 %v702_v25  ;;  %v230_v42 = vld [vmem:[%s1132_s1 + $0x1b8] sm:$0xff]  ;;  %v213_v44 = vld [vmem:[%s1132_s1 + $0x130] sm:$0xff]  ;;  %v200_v47 = vld [vmem:[%s1132_s1 + $0xc8] sm:$0xff]  ;;  %v678_v48 = vpack.c.bf16 %v182_v40, %v181_v37 }
  0x10   : > { %705 = vmatprep.subr.bf16.mxu1 %v704_v34  ;;  %v708_v43 = vpack.c.bf16 %v230_v42, %v229_v41  ;;  %v214_v45 = vld [vmem:[%s1132_s1 + $0x138] sm:$0xff]  ;;  %v231_v49 = vld [vmem:[%s1132_s1 + $0x1c0] sm:$0xff]  ;;  %v232_v50 = vld [vmem:[%s1132_s1 + $0x1c8] sm:$0xff]  ;;  %v680_v52 = vpack.c.bf16 %v200_v47, %v199_v46  ;;  %s966_s10 = scalar_lea.vmem %s1131_s0, %s760_s18 }
  0x11   : > { %675 = vmatpush3.bf16.msra.mxu0 %v674_v33  ;;  %v710_v51 = vpack.c.bf16 %v214_v45, %v213_v44  ;;  %v183_v53 = vld [vmem:[%s1132_s1 + $0x40] sm:$0xff]  ;;  %v184_v54 = vld [vmem:[%s1132_s1 + $0x48] sm:$0xff]  ;;  %v712_v56 = vpack.c.bf16 %v232_v50, %v231_v49  ;;  %v201_v58 = vld [vmem:[%s1132_s1 + $0xd0] sm:$0xff] }
  0x12   : > { %677 = vmatprep.subr.bf16.mxu0 %v676_v39  ;;  %v215_v55 = vld [vmem:[%s1132_s1 + $0x140] sm:$0xff]  ;;  %v216_v57 = vld [vmem:[%s1132_s1 + $0x148] sm:$0xff]  ;;  %v202_v59 = vld [vmem:[%s1132_s1 + $0xd8] sm:$0xff]  ;;  %v682_v62 = vpack.c.bf16 %v184_v54, %v183_v53 }
  0x13   : > { %707 = vmatpush3.bf16.msra.mxu1 %v706_v38  ;;  %v233_v60 = vld [vmem:[%s1132_s1 + $0x1d0] sm:$0xff]  ;;  %v234_v61 = vld [vmem:[%s1132_s1 + $0x1d8] sm:$0xff]  ;;  %v714_v63 = vpack.c.bf16 %v216_v57, %v215_v55  ;;  %v684_v0 = vpack.c.bf16 %v202_v59, %v201_v58  ;;  %v203_v6 = vld [vmem:[%s1132_s1 + $0xe0] sm:$0xff] }
  0x14   : > { %709 = vmatprep.subr.bf16.mxu1 %v708_v43  ;;  %v185_v1 = vld [vmem:[%s1132_s1 + $0x50] sm:$0xff]  ;;  %v186_v2 = vld [vmem:[%s1132_s1 + $0x58] sm:$0xff]  ;;  %v716_v4 = vpack.c.bf16 %v234_v61, %v233_v60  ;;  %v204_v7 = vld [vmem:[%s1132_s1 + $0xe8] sm:$0xff] }
  0x15   : > { %679 = vmatpush3.bf16.msra.mxu0 %v678_v48  ;;  %v217_v3 = vld [vmem:[%s1132_s1 + $0x150] sm:$0xff]  ;;  %v218_v5 = vld [vmem:[%s1132_s1 + $0x158] sm:$0xff]  ;;  %v235_v8 = vld [vmem:[%s1132_s1 + $0x1e0] sm:$0xff]  ;;  %v686_v10 = vpack.c.bf16 %v186_v2, %v185_v1  ;;  %v688_v14 = vpack.c.bf16 %v204_v7, %v203_v6 }
  0x16   : > { %681 = vmatprep.subr.bf16.mxu0 %v680_v52  ;;  %v236_v9 = vld [vmem:[%s1132_s1 + $0x1e8] sm:$0xff]  ;;  %v187_v11 = vld [vmem:[%s1132_s1 + $0x60] sm:$0xff]  ;;  %v718_v13 = vpack.c.bf16 %v218_v5, %v217_v3  ;;  %v205_v19 = vld [vmem:[%s1132_s1 + $0xf0] sm:$0xff] }
  0x17   : > { %711 = vmatpush3.bf16.msra.mxu1 %v710_v51  ;;  %v170_v12 = vld [vmem:[%s966_s10 + $0x8] sm:$0xff]  ;;  %v219_v16 = vld [vmem:[%s1132_s1 + $0x160] sm:$0xff]  ;;  %v720_v18 = vpack.c.bf16 %v236_v9, %v235_v8  ;;  %v206_v20 = vld [vmem:[%s1132_s1 + $0xf8] sm:$0xff] }
  0x18   : > { %713 = vmatprep.subr.bf16.mxu1 %v712_v56  ;;  %v188_v15 = vld [vmem:[%s1132_s1 + $0x68] sm:$0xff]  ;;  %342 = vmatprep.mubr.f32.mxu0 %v170_v12  ;;  %v172_v21 = vld [vmem:[%s966_s10 + $0x18] sm:$0xff]  ;;  %v237_v22 = vld [vmem:[%s1132_s1 + $0x1f0] sm:$0xff]  ;;  %v692_v26 = vpack.c.bf16 %v206_v20, %v205_v19 }
  0x19   : > { %683 = vmatpush3.bf16.msra.mxu0 %v682_v62  ;;  %v220_v17 = vld [vmem:[%s1132_s1 + $0x168] sm:$0xff]  ;;  %v238_v23 = vld [vmem:[%s1132_s1 + $0x1f8] sm:$0xff]  ;;  %412 = vmatprep.mubr.f32.mxu1 %v172_v21  ;;  %v690_v24 = vpack.c.bf16 %v188_v15, %v187_v11  ;;  %v189_v27 = vld [vmem:[%s1132_s1 + $0x70] sm:$0xff] }
  0x1a   : > { %685 = vmatprep.subr.bf16.mxu0 %v684_v0  ;;  %v722_v25 = vpack.c.bf16 %v220_v17, %v219_v16  ;;  %v190_v28 = vld [vmem:[%s1132_s1 + $0x78] sm:$0xff]  ;;  %v221_v29 = vld [vmem:[%s1132_s1 + $0x170] sm:$0xff]  ;;  %v724_v30 = vpack.c.bf16 %v238_v23, %v237_v22  ;;  %v255_v32 = vld [vmem:[%s1132_s1 + $0x280] sm:$0xff] }
  0x1b   : > { %715 = vmatpush3.bf16.msra.mxu1 %v714_v63  ;;  %v222_v31 = vld [vmem:[%s1132_s1 + $0x178] sm:$0xff]  ;;  %v256_v33 = vld [vmem:[%s1132_s1 + $0x288] sm:$0xff]  ;;  %v694_v34 = vpack.c.bf16 %v190_v28, %v189_v27  ;;  %v239_v37 = vld [vmem:[%s1132_s1 + $0x200] sm:$0xff] }
  0x1c   : > { %717 = vmatprep.subr.bf16.mxu1 %v716_v4  ;;  %v726_v35 = vpack.c.bf16 %v222_v31, %v221_v29  ;;  %v728_v36 = vpack.c.bf16 %v256_v33, %v255_v32  ;;  %v240_v38 = vld [vmem:[%s1132_s1 + $0x208] sm:$0xff]  ;;  %v257_v39 = vld [vmem:[%s1132_s1 + $0x290] sm:$0xff]  ;;  %v258_v40 = vld [vmem:[%s1132_s1 + $0x298] sm:$0xff] }
  0x1d   : > { %687 = vmatpush3.bf16.msra.mxu0 %v686_v10  ;;  %v169_v41 = vld [vmem:[%s966_s10] sm:$0xff]  ;;  %v730_v42 = vpack.c.bf16 %v240_v38, %v239_v37  ;;  %v171_v43 = vld [vmem:[%s966_s10 + $0x10] sm:$0xff]  ;;  %v732_v44 = vpack.c.bf16 %v258_v40, %v257_v39  ;;  %v242_v46 = vld [vmem:[%s1132_s1 + $0x218] sm:$0xff] }
  0x1e   : > { %689 = vmatprep.subr.bf16.mxu0 %v688_v14  ;;  %v241_v45 = vld [vmem:[%s1132_s1 + $0x210] sm:$0xff]  ;;  %v259_v47 = vld [vmem:[%s1132_s1 + $0x2a0] sm:$0xff]  ;;  %v260_v48 = vld [vmem:[%s1132_s1 + $0x2a8] sm:$0xff] }
  0x1f   : > { %719 = vmatpush3.bf16.msra.mxu1 %v718_v13  ;;  %v174_v49 = vld [vmem:[%s966_s10 + $0x28] sm:$0xff]  ;;  %v734_v50 = vpack.c.bf16 %v242_v46, %v241_v45  ;;  %v736_v51 = vpack.c.bf16 %v260_v48, %v259_v47  ;;  %v243_v52 = vld [vmem:[%s1132_s1 + $0x220] sm:$0xff]  ;;  %v261_v54 = vld [vmem:[%s1132_s1 + $0x2b0] sm:$0xff] }
  0x20   : > { %721 = vmatprep.subr.bf16.mxu1 %v720_v18  ;;  %v244_v53 = vld [vmem:[%s1132_s1 + $0x228] sm:$0xff]  ;;  %v262_v55 = vld [vmem:[%s1132_s1 + $0x2b8] sm:$0xff]  ;;  %v245_v58 = vld [vmem:[%s1132_s1 + $0x230] sm:$0xff] }
  0x21   : > { %691 = vmatpush3.bf16.msra.mxu0 %v690_v24  ;;  %v738_v56 = vpack.c.bf16 %v244_v53, %v243_v52  ;;  %v740_v57 = vpack.c.bf16 %v262_v55, %v261_v54  ;;  %v246_v59 = vld [vmem:[%s1132_s1 + $0x238] sm:$0xff]  ;;  %v263_v60 = vld [vmem:[%s1132_s1 + $0x2c0] sm:$0xff]  ;;  %v264_v61 = vld [vmem:[%s1132_s1 + $0x2c8] sm:$0xff] }
  0x22   : > { %693 = vmatprep.subr.bf16.mxu0 %v692_v26  ;;  %v742_v62 = vpack.c.bf16 %v246_v59, %v245_v58  ;;  %v744_v63 = vpack.c.bf16 %v264_v61, %v263_v60  ;;  %v247_v0 = vld [vmem:[%s1132_s1 + $0x240] sm:$0xff]  ;;  %v248_v1 = vld [vmem:[%s1132_s1 + $0x248] sm:$0xff]  ;;  %v265_v2 = vld [vmem:[%s1132_s1 + $0x2d0] sm:$0xff] }
  0x23   : > { %723 = vmatpush3.bf16.msra.mxu1 %v722_v25  ;;  %v266_v3 = vld [vmem:[%s1132_s1 + $0x2d8] sm:$0xff]  ;;  %v746_v4 = vpack.c.bf16 %v248_v1, %v247_v0  ;;  %v249_v6 = vld [vmem:[%s1132_s1 + $0x250] sm:$0xff]  ;;  %v267_v8 = vld [vmem:[%s1132_s1 + $0x2e0] sm:$0xff] }
  0x24   : > { %725 = vmatprep.subr.bf16.mxu1 %v724_v30  ;;  %v748_v5 = vpack.c.bf16 %v266_v3, %v265_v2  ;;  %v250_v7 = vld [vmem:[%s1132_s1 + $0x258] sm:$0xff]  ;;  %v268_v9 = vld [vmem:[%s1132_s1 + $0x2e8] sm:$0xff]  ;;  %v251_v12 = vld [vmem:[%s1132_s1 + $0x260] sm:$0xff] }
  0x25   : > { %695 = vmatpush3.bf16.msra.mxu0 %v694_v34  ;;  %v750_v10 = vpack.c.bf16 %v250_v7, %v249_v6  ;;  %v752_v11 = vpack.c.bf16 %v268_v9, %v267_v8  ;;  %v252_v13 = vld [vmem:[%s1132_s1 + $0x268] sm:$0xff]  ;;  %v269_v14 = vld [vmem:[%s1132_s1 + $0x2f0] sm:$0xff]  ;;  %v270_v15 = vld [vmem:[%s1132_s1 + $0x2f8] sm:$0xff] }
  0x26   : > { %729 = vmatprep.subr.bf16.mxu0 %v728_v36  ;;  %v754_v16 = vpack.c.bf16 %v252_v13, %v251_v12  ;;  %v756_v17 = vpack.c.bf16 %v270_v15, %v269_v14  ;;  %v253_v18 = vld [vmem:[%s1132_s1 + $0x270] sm:$0xff]  ;;  %v254_v19 = vld [vmem:[%s1132_s1 + $0x278] sm:$0xff]  ;;  %v173_v21 = vld [vmem:[%s966_s10 + $0x20] sm:$0xff]  ;;  %s555_s10 = sshll.u32 %s1137_s13, 3 }
  0x27   : > { %727 = vmatpush3.bf16.msra.mxu1 %v726_v35  ;;  %v758_v20 = vpack.c.bf16 %v254_v19, %v253_v18  ;;  %v556_v23 = vld [vmem:[%s1133_s2] ss:$0 sm:$0xff]  ;;  %s168_s20 = scalar_lea.vmem %s1134_s3, %s555_s10 }
  0x28   : > { %343 = vmatmul.mubr.f32.vlgmr.msra.gmra.mrb[0].mxu0 %v169_v41 }
  0x29   : > { %731 = vmatpush3.bf16.msra.mxu0 %v730_v42  ;;  %482 = vmatprep.mubr.f32.mxu0 %v174_v49 }
  0x2a   : > { %413 = vmatmul.mubr.f32.vlgmr.msra.gmra.mrb[0].mxu1 %v171_v43  ;;  %733 = vmatprep.subr.bf16.mxu0 %v732_v44 }
  0x2d   : > { %735 = vmatpush3.bf16.msra.mxu0 %v734_v50 }
  0x2e   : > { %737 = vmatprep.subr.bf16.mxu0 %v736_v51 }
  0x31   : > { %739 = vmatpush3.bf16.msra.mxu0 %v738_v56 }
  0x32   : > { %741 = vmatprep.subr.bf16.mxu0 %v740_v57 }
  0x35   : > { %743 = vmatpush3.bf16.msra.mxu0 %v742_v62 }
  0x36   : > { %745 = vmatprep.subr.bf16.mxu0 %v744_v63 }
  0x39   : > { %747 = vmatpush3.bf16.msra.mxu0 %v746_v4 }
  0x3a   : > { %749 = vmatprep.subr.bf16.mxu0 %v748_v5 }
  0x3d   : > { %751 = vmatpush3.bf16.msra.mxu0 %v750_v10 }
  0x3e   : > { %753 = vmatprep.subr.bf16.mxu0 %v752_v11 }
  0x41   : > { %755 = vmatpush3.bf16.msra.mxu0 %v754_v16 }
  0x42   : > { %757 = vmatprep.subr.bf16.mxu0 %v756_v17 }
  0x45   : > { %759 = vmatpush3.bf16.msra.mxu0 %v758_v20 }
  0x48   : > { %483 = vmatmul.mubr.f32.vlgmr.msra.gmra.mrb[2].mxu0 %v173_v21 }
  0xfb   : > { %v591_v22 = vpop.f32.mrb[0].mxu0 }
  0xfc   : > { %v592_v24 = vpop.f32.mrb[1].mxu0 }
  0xfd   : > { %v626_v25 = vpop.f32.mrb[0].mxu1  ;;  %v593_v26 = vadd.f32 %v592_v24, %v591_v22 }
  0xfe   : > { %v627_v27 = vpop.f32.mrb[1].mxu1 }
  0xff   : > { %v628_v28 = vadd.f32 %v627_v27, %v626_v25  ;;  %v345_v29 = vadd.f32 %v593_v26, %v556_v23 }
 0x101   : > { %v415_v30 = vadd.f32 %v628_v28, %v345_v29 }
 0x11b   : > { %v661_v31 = vpop.f32.mrb[2].mxu0 }
 0x11c   : > { %v662_v32 = vpop.f32.mrb[3].mxu0 }
 0x11d   : > { %v663_v33 = vadd.f32 %v662_v32, %v661_v31 }
 0x11f   : > { %v485_v34 = vadd.f32 %v663_v33, %v415_v30 }
 0x121   : > { %v488_v35 = vsub.f32 0.0, %v485_v34 }
 0x123   : > { %v489_v36 = vmul.f32 1.442695, %v488_v35 }
 0x125   : > { %769 = vpow2.f32 %v489_v36 }
 0x12f   : > { %v770_v37 = vpop.eup %769 }
 0x130   : > { %v491_v38 = vadd.f32 1.0, %v770_v37 }
 0x132   : > { %771 = vrcp.f32 %v491_v38 }
 0x13c   : > { %v772_v39 = vpop.eup %771 }
 0x13d   : > { %495 = vst.msk [vmem:[%s168_s20] sm:$0xff] %vm494_vm0, %v772_v39 }
 0x13e PF: > { %s13_s12 = sadd.s32 1, %s779_s12  }
 0x13f   : > { %p10_p4 = scmp.ge.s32.totalorder %s13_s12, 4  }
 0x141   :  { %12 = sbr.rel (!%p10_p4) target bundleno = 1 (0x1), region = 62 }

</bundles_post_ra>
